<compile_context>
chip_gen: v7x
topology: tpu7x:2x2x1
jax: 0.10.0
libtpu: 0.0.40
codegen_flags: <defaults>
</compile_context>

<pallas_src>
import numpy as np
import jax
import jax.numpy as jnp
from jax.experimental import pallas as pl
from jax.experimental.pallas import tpu as pltpu

# ----------------------- small synthetic configuration -----------------------
B = 2            # image batch
C = 3            # RGB (CLIP normalize has 3-channel mean/std)
H = W = 16       # input spatial size (orig module expects 1024)
SCALE = 7        # torch.nn.Upsample(scale_factor=7), mode='nearest'
POOL = 16        # AvgPool2d kernel (orig: 1024 // 32 = 32), scaled down
HO = (H * SCALE) // POOL   # 7
WO = (W * SCALE) // POOL   # 7

T = 1            # number of text prompts (kernel assumes T == 1)
L = 8            # token sequence length
VOCAB = 64
D_TOK = 16       # token embedding width
D_EMB = 32       # joint CLIP embedding dim
LOGIT_SCALE = 100.0   # multiplied in and divided right back out by the module

CLIP_MEAN = np.array([0.48145466, 0.4578275, 0.40821073], np.float32)
CLIP_STD = np.array([0.26862954, 0.26130258, 0.27577711], np.float32)


def _pool_matrix(n_in, scale, pool):
    """A[i, p] = fraction of the i-th avg-pool window (on the x`scale`
    nearest-upsampled axis) that comes from input index p.  Rows sum to 1."""
    n_out = (n_in * scale) // pool
    A = np.zeros((n_out, n_in), np.float32)
    for i in range(n_out):
        for u in range(i * pool, (i + 1) * pool):
            A[i, u // scale] += 1.0 / pool
    return A


# ------------------------------ the fused kernel ------------------------------
def _clip_loss_kernel(tok_ref, x_ref, w_ref, b_ref, e_ref, out_ref):
    # ---- image path: one bf16 MXU matmul with the host-folded weights -------
    #   preprocess (normalize/upsample/avgpool) + image projection, exactly.
    img_emb = jnp.dot(x_ref[...].astype(jnp.bfloat16), w_ref[...],
                      preferred_element_type=jnp.float32) + b_ref[...]   # (B, D_EMB)

    # ---- text path: mean over tokens commutes with the folded linear map ----
    # Token ids live in SMEM; gather L rows of the VMEM-resident folded table
    # E = tok_table @ w_txt with scalar-indexed dynamic slices (no one_hot,
    # no MXU, no extra HBM round-trip).
    txt_acc = jnp.zeros((1, D_EMB), jnp.float32)
    for l in range(L):                                     # L = 8, unrolled
        txt_acc = txt_acc + e_ref[pl.ds(tok_ref[l], 1), :]
    txt_emb = txt_acc * (1.0 / L)                          # (1, D_EMB), T == 1

    # ---- CLIP head (VPU/XLU only; the N=1 MXU contraction is gone) ----------
    # rsqrt(sum(x^2)+eps) vs torch's clamp-on-norm: differs only for ~zero
    # embeddings.  similarity = 1 - (scale*cos)/scale == 1 - cos (exact).
    img_n = img_emb * jax.lax.rsqrt(
        jnp.sum(img_emb * img_emb, axis=-1, keepdims=True) + 1e-12)
    txt_n = txt_emb * jax.lax.rsqrt(
        jnp.sum(txt_emb * txt_emb, axis=-1, keepdims=True) + 1e-12)
    cos = jnp.sum(img_n * txt_n, axis=-1, keepdims=True)   # (B, 1) = (B, T)
    out_ref[...] = 1.0 - cos    # single tiny (B, T) store — the only HBM write


# --------------------------------- forward ------------------------------------
def clip_loss_forward(image, text_tokens, params):
    x_flat = image.reshape(B, C * H * W)          # free XLA-side relayout
    # TODO(synk): clip.tokenize (BPE) has no Pallas equivalent; integer token
    # ids are taken as input and handed to the kernel through SMEM.
    tok_flat = text_tokens.reshape(T * L).astype(jnp.int32)   # T == 1

    sim = pl.pallas_call(
        _clip_loss_kernel,
        out_shape=jax.ShapeDtypeStruct((B, T), jnp.float32),
        in_specs=[
            pl.BlockSpec(memory_space=pltpu.MemorySpace.SMEM),   # token ids
            pl.BlockSpec(memory_space=pltpu.MemorySpace.VMEM),   # x_flat
            pl.BlockSpec(memory_space=pltpu.MemorySpace.VMEM),   # W_img_folded
            pl.BlockSpec(memory_space=pltpu.MemorySpace.VMEM),   # b_img
            pl.BlockSpec(memory_space=pltpu.MemorySpace.VMEM),   # E_folded
        ],
        out_specs=pl.BlockSpec(memory_space=pltpu.MemorySpace.VMEM),
    )(tok_flat, x_flat, params["w_img_folded"], params["b_img"],
      params["e_folded"])
    # NOTE: the module returns similarity[0, 0] only; other batch/prompt
    # entries are computed and discarded (mirrors the spec exactly).
    return sim[0, 0]


# ------------------------------ parameter setup --------------------------------
def make_params(key):
    k_table, k_wimg, k_wtxt = jax.random.split(key, 3)

    tok_table = 0.02 * jax.random.normal(k_table, (VOCAB, D_TOK), jnp.float32)
    w_img = 0.02 * jax.random.normal(k_wimg, (C * HO * WO, D_EMB), jnp.float32)
    w_txt = 0.02 * jax.random.normal(k_wtxt, (D_TOK, D_EMB), jnp.float32)

    # normalize + nearest-upsample + avgpool as one affine map, per channel:
    #   pooled_c = a_c * kron(A, A) @ x_c + b_c,  rows of A sum to 1.
    A = _pool_matrix(H, SCALE, POOL)                     # (HO, H)
    kron_t = np.kron(A, A).T                             # (H*W, HO*WO)
    a = (0.5 / CLIP_STD).astype(np.float32)              # normalize scale fold
    b = ((0.5 - CLIP_MEAN) / CLIP_STD).astype(np.float32)  # normalize shift fold
    q = np.zeros((C * H * W, C * HO * WO), np.float32)
    for c in range(C):
        q[c * H * W:(c + 1) * H * W,
          c * HO * WO:(c + 1) * HO * WO] = a[c] * kron_t
    pool_bias = np.repeat(b, HO * WO)[None, :].astype(np.float32)   # (1, C*HO*WO)

    q = jnp.asarray(q)
    pool_bias = jnp.asarray(pool_bias)

    return {
        # --- folded weights consumed by the kernel ---
        "w_img_folded": (q @ w_img).astype(jnp.bfloat16),   # (768, 32) bf16
        "b_img": pool_bias @ w_img,                          # (1, 32)  f32
        "e_folded": tok_table @ w_txt,                        # (64, 32) f32
        # --- unfolded originals, only for the pure-JAX reference ---
        "tok_table": tok_table,
        "w_img": w_img,
        "w_txt": w_txt,
    }


# --------------------- pure-JAX reference (mirrors the module) -----------------
def clip_loss_reference(image, text_tokens, params):
    x = (image + 1.0) * 0.5
    x = (x - CLIP_MEAN.reshape(1, C, 1, 1)) / CLIP_STD.reshape(1, C, 1, 1)
    up = jnp.repeat(jnp.repeat(x, SCALE, axis=2), SCALE, axis=3)     # nearest x7
    pooled = up.reshape(B, C, HO, POOL, WO, POOL).mean(axis=(3, 5))  # AvgPool2d
    img_emb = pooled.reshape(B, C * HO * WO) @ params["w_img"]
    tok_emb = params["tok_table"][text_tokens]
    txt_emb = tok_emb.mean(axis=1) @ params["w_txt"]
    img_n = img_emb / jnp.linalg.norm(img_emb, axis=-1, keepdims=True)
    txt_n = txt_emb / jnp.linalg.norm(txt_emb, axis=-1, keepdims=True)
    logits = LOGIT_SCALE * (img_n @ txt_n.T)
    return (1.0 - logits / LOGIT_SCALE)[0, 0]


if __name__ == "__main__":
    key = jax.random.PRNGKey(0)
    k_img, k_tok, k_param = jax.random.split(key, 3)

    image = jax.random.uniform(k_img, (B, C, H, W), jnp.float32,
                               minval=-1.0, maxval=1.0)
    # NOTE: out-of-range ids would be a caller error (torch embedding raises);
    # these are generated in-range.
    text_tokens = jax.random.randint(k_tok, (T, L), 0, VOCAB)
    params = make_params(k_param)

    out = jax.jit(clip_loss_forward)(image, text_tokens, params)
    jax.block_until_ready(out)

    ref = clip_loss_reference(image, text_tokens, params)
    assert out.shape == () and out.dtype == jnp.float32
    # 5e-3 tolerance: covers bf16 quantization of the folded image weights
    # (accumulation is f32 via preferred_element_type).
    assert abs(float(out) - float(ref)) < 5e-3, (float(out), float(ref))
    print("KERNEL_OK")
</pallas_src>

<mosaic_0001>
module attributes {stable_mosaic.version = 11 : i64} {
  func.func @_clip_loss_kernel(%arg0: memref<8xi32, #tpu.memory_space<smem>>, %arg1: memref<2x768xf32, #tpu.memory_space<vmem>>, %arg2: memref<768x32xbf16, #tpu.memory_space<vmem>>, %arg3: memref<1x32xf32, #tpu.memory_space<vmem>>, %arg4: memref<64x32xf32, #tpu.memory_space<vmem>>, %arg5: memref<2x1xf32, #tpu.memory_space<vmem>>) attributes {dimension_semantics = [], scalar_prefetch = 0 : i64, scratch_operands = 0 : i64, tpu.core_type = #tpu.core_type<tc>} {
    %c0 = arith.constant 0 : index
    %c0_0 = arith.constant 0 : index
    %0 = vector.load %arg1[%c0, %c0_0] : memref<2x768xf32, #tpu.memory_space<vmem>>, vector<2x768xf32>
    %1 = arith.truncf %0 : vector<2x768xf32> to vector<2x768xbf16>
    %c0_1 = arith.constant 0 : index
    %c0_2 = arith.constant 0 : index
    %2 = vector.load %arg2[%c0_1, %c0_2] : memref<768x32xbf16, #tpu.memory_space<vmem>>, vector<768x32xbf16>
    %cst = arith.constant dense<0.000000e+00> : vector<2x32xf32>
    %3 = tpu.matmul %1, %2, %cst {dimension_numbers = #tpu.dot_dimension_numbers<[1], [0], [0], [1], [0, 0, 1, 1], [], []>} : vector<2x768xbf16>, vector<768x32xbf16>, vector<2x32xf32> -> vector<2x32xf32>
    %c0_3 = arith.constant 0 : index
    %c0_4 = arith.constant 0 : index
    %4 = vector.load %arg3[%c0_3, %c0_4] : memref<1x32xf32, #tpu.memory_space<vmem>>, vector<1x32xf32>
    %5 = vector.broadcast %4 : vector<1x32xf32> to vector<2x32xf32>
    %6 = arith.addf %3, %5 : vector<2x32xf32>
    %cst_5 = arith.constant 0.000000e+00 : f32
    %7 = vector.broadcast %cst_5 : f32 to vector<1x32xf32>
    %c0_6 = arith.constant 0 : index
    %8 = memref.load %arg0[%c0_6] : memref<8xi32, #tpu.memory_space<smem>>
    %9 = arith.index_cast %8 : i32 to index
    %c0_7 = arith.constant 0 : index
    %10 = vector.load %arg4[%9, %c0_7] : memref<64x32xf32, #tpu.memory_space<vmem>>, vector<1x32xf32>
    %11 = arith.addf %7, %10 : vector<1x32xf32>
    %c1 = arith.constant 1 : index
    %12 = memref.load %arg0[%c1] : memref<8xi32, #tpu.memory_space<smem>>
    %13 = arith.index_cast %12 : i32 to index
    %c0_8 = arith.constant 0 : index
    %14 = vector.load %arg4[%13, %c0_8] : memref<64x32xf32, #tpu.memory_space<vmem>>, vector<1x32xf32>
    %15 = arith.addf %11, %14 : vector<1x32xf32>
    %c2 = arith.constant 2 : index
    %16 = memref.load %arg0[%c2] : memref<8xi32, #tpu.memory_space<smem>>
    %17 = arith.index_cast %16 : i32 to index
    %c0_9 = arith.constant 0 : index
    %18 = vector.load %arg4[%17, %c0_9] : memref<64x32xf32, #tpu.memory_space<vmem>>, vector<1x32xf32>
    %19 = arith.addf %15, %18 : vector<1x32xf32>
    %c3 = arith.constant 3 : index
    %20 = memref.load %arg0[%c3] : memref<8xi32, #tpu.memory_space<smem>>
    %21 = arith.index_cast %20 : i32 to index
    %c0_10 = arith.constant 0 : index
    %22 = vector.load %arg4[%21, %c0_10] : memref<64x32xf32, #tpu.memory_space<vmem>>, vector<1x32xf32>
    %23 = arith.addf %19, %22 : vector<1x32xf32>
    %c4 = arith.constant 4 : index
    %24 = memref.load %arg0[%c4] : memref<8xi32, #tpu.memory_space<smem>>
    %25 = arith.index_cast %24 : i32 to index
    %c0_11 = arith.constant 0 : index
    %26 = vector.load %arg4[%25, %c0_11] : memref<64x32xf32, #tpu.memory_space<vmem>>, vector<1x32xf32>
    %27 = arith.addf %23, %26 : vector<1x32xf32>
    %c5 = arith.constant 5 : index
    %28 = memref.load %arg0[%c5] : memref<8xi32, #tpu.memory_space<smem>>
    %29 = arith.index_cast %28 : i32 to index
    %c0_12 = arith.constant 0 : index
    %30 = vector.load %arg4[%29, %c0_12] : memref<64x32xf32, #tpu.memory_space<vmem>>, vector<1x32xf32>
    %31 = arith.addf %27, %30 : vector<1x32xf32>
    %c6 = arith.constant 6 : index
    %32 = memref.load %arg0[%c6] : memref<8xi32, #tpu.memory_space<smem>>
    %33 = arith.index_cast %32 : i32 to index
    %c0_13 = arith.constant 0 : index
    %34 = vector.load %arg4[%33, %c0_13] : memref<64x32xf32, #tpu.memory_space<vmem>>, vector<1x32xf32>
    %35 = arith.addf %31, %34 : vector<1x32xf32>
    %c7 = arith.constant 7 : index
    %36 = memref.load %arg0[%c7] : memref<8xi32, #tpu.memory_space<smem>>
    %37 = arith.index_cast %36 : i32 to index
    %c0_14 = arith.constant 0 : index
    %38 = vector.load %arg4[%37, %c0_14] : memref<64x32xf32, #tpu.memory_space<vmem>>, vector<1x32xf32>
    %39 = arith.addf %35, %38 : vector<1x32xf32>
    %cst_15 = arith.constant 1.250000e-01 : f32
    %40 = vector.broadcast %cst_15 : f32 to vector<1x32xf32>
    %41 = arith.mulf %39, %40 : vector<1x32xf32>
    %42 = arith.mulf %6, %6 : vector<2x32xf32>
    %cst_16 = arith.constant dense<0.000000e+00> : vector<2xf32>
    %43 = vector.multi_reduction <add>, %42, %cst_16 [1] : vector<2x32xf32> to vector<2xf32>
    %44 = vector.shape_cast %43 : vector<2xf32> to vector<2x1xf32>
    %cst_17 = arith.constant 9.99999996E-13 : f32
    %45 = vector.broadcast %cst_17 : f32 to vector<2x1xf32>
    %46 = arith.addf %44, %45 : vector<2x1xf32>
    %47 = math.rsqrt %46 : vector<2x1xf32>
    %48 = vector.broadcast %47 : vector<2x1xf32> to vector<2x32xf32>
    %49 = arith.mulf %6, %48 : vector<2x32xf32>
    %50 = arith.mulf %41, %41 : vector<1x32xf32>
    %cst_18 = arith.constant dense<0.000000e+00> : vector<1xf32>
    %51 = vector.multi_reduction <add>, %50, %cst_18 [1] : vector<1x32xf32> to vector<1xf32>
    %52 = vector.shape_cast %51 : vector<1xf32> to vector<1x1xf32>
    %cst_19 = arith.constant 9.99999996E-13 : f32
    %53 = vector.broadcast %cst_19 : f32 to vector<1x1xf32>
    %54 = arith.addf %52, %53 : vector<1x1xf32>
    %55 = math.rsqrt %54 : vector<1x1xf32>
    %56 = vector.broadcast %55 : vector<1x1xf32> to vector<1x32xf32>
    %57 = arith.mulf %41, %56 : vector<1x32xf32>
    %58 = vector.broadcast %57 : vector<1x32xf32> to vector<2x32xf32>
    %59 = arith.mulf %49, %58 : vector<2x32xf32>
    %cst_20 = arith.constant dense<0.000000e+00> : vector<2xf32>
    %60 = vector.multi_reduction <add>, %59, %cst_20 [1] : vector<2x32xf32> to vector<2xf32>
    %61 = vector.shape_cast %60 : vector<2xf32> to vector<2x1xf32>
    %cst_21 = arith.constant 1.000000e+00 : f32
    %62 = vector.broadcast %cst_21 : f32 to vector<2x1xf32>
    %63 = arith.subf %62, %61 : vector<2x1xf32>
    %c0_22 = arith.constant 0 : index
    %c0_23 = arith.constant 0 : index
    %64 = vector.load %arg5[%c0_22, %c0_23] : memref<2x1xf32, #tpu.memory_space<vmem>>, vector<2x1xf32>
    tpu.vector_store %arg5[%c0_22, %c0_23], %63 {strides = array<i32>} : memref<2x1xf32, #tpu.memory_space<vmem>>, vector<2x1xf32>,
    return
  }
}

</mosaic_0001>

<bundles_post_ra>
// kernel: clip_loss_forward.1
= control target key start
LH: loop header
LB: loop body
LE: loop exit
PB: predicated region body
PF: predicated region fallthrough
CT: control target
= control target key end

     0   :  { %10 = vsyncpa [#allocation3], 0  ;;  %s1072_s0 = inlined_call_operand.vmem [shape: s32[8], index: 0, kind: input, shape index: {}]   ;;  %s1073_s1 = inlined_call_operand.vmem [shape: f32[2,768], index: 1, kind: input, shape index: {}]   ;;  %s1074_s2 = inlined_call_operand.vmem [shape: bf16[768,32], index: 2, kind: input, shape index: {}]   ;;  %s1075_s3 = inlined_call_operand.vmem [shape: f32[1,32], index: 3, kind: input, shape index: {}]   ;;  %s1076_s4 = inlined_call_operand.vmem [shape: f32[64,32], index: 4, kind: input, shape index: {}]   ;;  %s1077_s5 = inlined_call_operand.vmem [shape: f32[2,1], index: 5, kind: output, shape index: {}]  }
   0x1   :  { %s17_s20 = sshll.u32 %s1072_s0, 4  ;;  %s18_s20 = int_to_ptr.vmem [resolvable:$true] %s17_s20 }
   0x2   :  { %s837_s21 = scalar_lea.vmem %s18_s20, 16  ;;  %p842_p1 = scmp.lt.s32.totalorder %s18_s20, %s18_s20 }
   0x3   :  { %p838_p0 = scmp.ne.s32.totalorder %s18_s20, %s837_s21  ;;  %p843_p2 = scmp.lt.s32.totalorder %s837_s21, %s837_s21 }
   0x5   :  { %p844_p3 = por %p843_p2, %p842_p1 }
   0x7   :  { %p845_p4 = pnand %p844_p3, %p838_p0 }
   0x9   :  { %848 = shalt.err (!%p845_p4)
}
   0xa   :  { %s851_s22 = smov [#allocation2]  }
   0xb   :  { %20 = dma.vmem_to_smem %s18_s20, 16, %s851_s22, [#allocation3]  }
   0xc   :  { %849 = dma.done.wait [#allocation3], 16  }
   0xd   :  { %850 = vsyncadd [#allocation3], 4294967280 }
   0xe   :  { %32 = sfence }
   0xf   :  { %v784_v0 = vld [vmem:[%s1074_s2 + $0x40] sm:$0xff]   ;;  %v788_v4 = vld [vmem:[%s1074_s2 + $0x48] sm:$0xff]   ;;  %v792_v8 = vld [vmem:[%s1074_s2 + $0x50] sm:$0xff]   ;;  %v42_v27 = vlaneseq  ;;  %v852_v35 = vmov 1983009808   ;;  %s586_s18 = sld [smem:[#allocation2]] }
  0x10   :  { %v785_v1 = vld [vmem:[%s1074_s2] sm:$0xff]   ;;  %716 = vmatprep.subr.bf16.mxu0 %v784_v0  ;;  %v789_v5 = vld [vmem:[%s1074_s2 + $0x8] sm:$0xff]   ;;  %v793_v9 = vld [vmem:[%s1074_s2 + $0x10] sm:$0xff]   ;;  %v40_v36 = vunpack.c.l.s4 %v852_v35  ;;  %s709_s19 = sld [smem:[#allocation2 + $0x1]]  ;;  %s710_s20 = sld [smem:[#allocation2 + $0x2]]  ;;  %vm628_vm0 = vcmask 253952  }
  0x11   :  { %v786_v2 = vld [vmem:[%s1074_s2 + $0xc0] sm:$0xff]   ;;  %717 = vmatpush3.bf16.msra.mxu0 %v785_v1  ;;  %v790_v6 = vld [vmem:[%s1074_s2 + $0xc8] sm:$0xff]   ;;  %v794_v10 = vld [vmem:[%s1074_s2 + $0xd0] sm:$0xff]   ;;  %v979_v32 = vshrl.u32 %v42_v27, 7  ;;  %s711_s21 = sld [smem:[#allocation2 + $0x3]]  ;;  %s712_s27 = sld [smem:[#allocation2 + $0x4]] }
  0x12   :  { %v787_v3 = vld [vmem:[%s1074_s2 + $0x80] sm:$0xff]   ;;  %738 = vmatprep.subr.bf16.mxu1 %v786_v2  ;;  %718 = vmatprep.subr.bf16.mxu0 %v788_v4  ;;  %v791_v7 = vld [vmem:[%s1074_s2 + $0x88] sm:$0xff]   ;;  %v795_v11 = vld [vmem:[%s1074_s2 + $0x90] sm:$0xff]   ;;  %v41_v38 = vunpack.c.0.s8 %v40_v36  ;;  %s713_s29 = sld [smem:[#allocation2 + $0x5]]  ;;  %s714_s8 = sld [smem:[#allocation2 + $0x6]]  ;;  %vm620_vm1 = vcmask 254976  }
  0x13   :  { %739 = vmatpush3.bf16.msra.mxu1 %v787_v3  ;;  %v796_v12 = vld [vmem:[%s1074_s2 + $0x58] sm:$0xff]   ;;  %v800_v16 = vld [vmem:[%s1074_s2 + $0x60] sm:$0xff]   ;;  %v804_v20 = vld [vmem:[%s1074_s2 + $0x68] sm:$0xff]   ;;  %s715_s9 = sld [smem:[#allocation2 + $0x7]]  ;;  %vm644_vm2 = vcmask 1024  }
  0x14   :  { %740 = vmatprep.subr.bf16.mxu1 %v790_v6  ;;  %v797_v13 = vld [vmem:[%s1074_s2 + $0x18] sm:$0xff]   ;;  %v801_v17 = vld [vmem:[%s1074_s2 + $0x20] sm:$0xff]   ;;  %v805_v21 = vld [vmem:[%s1074_s2 + $0x28] sm:$0xff]   ;;  %v44_v40 = vsub.s32 %v41_v38, %v979_v32 }
  0x15   :  { %719 = vmatpush3.bf16.msra.mxu0 %v789_v5  ;;  %v798_v14 = vld [vmem:[%s1074_s2 + $0xd8] sm:$0xff]   ;;  %v802_v18 = vld [vmem:[%s1074_s2 + $0xe0] sm:$0xff]   ;;  %v806_v22 = vld [vmem:[%s1074_s2 + $0xe8] sm:$0xff]   ;;  %s587_s24 = scalar_lea.vmem %s1076_s4, %s586_s18 }
  0x16   :  { %720 = vmatprep.subr.bf16.mxu0 %v792_v8  ;;  %v799_v15 = vld [vmem:[%s1074_s2 + $0x98] sm:$0xff]   ;;  %v803_v19 = vld [vmem:[%s1074_s2 + $0xa0] sm:$0xff]   ;;  %v807_v23 = vld [vmem:[%s1074_s2 + $0xa8] sm:$0xff]   ;;  %s591_s0 = scalar_lea.vmem %s1076_s4, %s709_s19  ;;  %s595_s28 = scalar_lea.vmem %s1076_s4, %s710_s20 }
  0x17   :  { %741 = vmatpush3.bf16.msra.mxu1 %v791_v7  ;;  %v808_v24 = vld [vmem:[%s1074_s2 + $0x70] sm:$0xff]   ;;  %v812_v29 = vld [vmem:[%s1074_s2 + $0x78] sm:$0xff]   ;;  %v34_v33 = vld [vmem:[%s1073_s1] sm:$0xff]  ;;  %s599_s7 = scalar_lea.vmem %s1076_s4, %s711_s21  ;;  %s603_s12 = scalar_lea.vmem %s1076_s4, %s712_s27 }
  0x18   :  { %742 = vmatprep.subr.bf16.mxu1 %v794_v10  ;;  %v809_v25 = vld [vmem:[%s1074_s2 + $0x30] sm:$0xff]   ;;  %v813_v30 = vld [vmem:[%s1074_s2 + $0x38] sm:$0xff]   ;;  %v816_v37 = vld [vmem:[%s1074_s2 + $0x140] sm:$0xff]   ;;  %v38_v39 = vcombine.high %v34_v33, %v34_v33  ;;  %v45_v41 = vrot.slane %v34_v33, %v44_v40  ;;  %s607_s15 = scalar_lea.vmem %s1076_s4, %s713_s29  ;;  %s611_s18 = scalar_lea.vmem %s1076_s4, %s714_s8 }
  0x19   :  { %721 = vmatpush3.bf16.msra.mxu0 %v793_v9  ;;  %v810_v26 = vld [vmem:[%s1074_s2 + $0xf0] sm:$0xff]   ;;  %v814_v31 = vld [vmem:[%s1074_s2 + $0xf8] sm:$0xff]   ;;  %v818_v49 = vld [vmem:[%s1074_s2 + $0x100] sm:$0xff]   ;;  %s615_s21 = scalar_lea.vmem %s1076_s4, %s715_s9 }
  0x1a   :  { %722 = vmatprep.subr.bf16.mxu0 %v796_v12  ;;  %v811_v28 = vld [vmem:[%s1074_s2 + $0xb0] sm:$0xff]   ;;  %v815_v34 = vld [vmem:[%s1074_s2 + $0xb8] sm:$0xff]   ;;  %v52_v42 = vrot.slane %v38_v39, %v44_v40  ;;  %v53_v43 = vcombine.high %v45_v41, %v45_v41  ;;  %v69_v45 = vpack.c.bf16 %v45_v41, %v45_v41  ;;  %v819_v50 = vld [vmem:[%s1074_s2 + $0x148] sm:$0xff]  }
  0x1b   :  { %743 = vmatpush3.bf16.msra.mxu1 %v795_v11  ;;  %v820_v51 = vld [vmem:[%s1074_s2 + $0x108] sm:$0xff]   ;;  %v821_v52 = vld [vmem:[%s1074_s2 + $0x150] sm:$0xff]   ;;  %v823_v56 = vld [vmem:[%s1074_s2 + $0x158] sm:$0xff]  }
  0x1c   :  { %744 = vmatprep.subr.bf16.mxu1 %v798_v14  ;;  %v54_v44 = vcombine.high %v52_v42, %v52_v42  ;;  %v71_v46 = vpack.c.bf16 %v52_v42, %v52_v42  ;;  %v70_v47 = vpack.c.bf16 %v53_v43, %v53_v43  ;;  %v659_v53 = vld.sshfl [vmem:[%s1073_s1 + $0x8] sm:$0x33 pattern:$0x76325410]  ;;  %v822_v55 = vld [vmem:[%s1074_s2 + $0x110] sm:$0xff]   ;;  %v824_v58 = vld [vmem:[%s1074_s2 + $0x118] sm:$0xff]  }
  0x1d   :  { %723 = vmatpush3.bf16.msra.mxu0 %v797_v13  ;;  %v62_v54 = vcombine.high %v659_v53, %v659_v53  ;;  %v825_v59 = vld [vmem:[%s1074_s2 + $0x160] sm:$0xff]   ;;  %v827_v61 = vld [vmem:[%s1074_s2 + $0x168] sm:$0xff]   ;;  %v829_v63 = vld [vmem:[%s1074_s2 + $0x170] sm:$0xff]   ;;  %v73_v3 = vpack.c.bf16 %v659_v53, %v659_v53 }
  0x1e   :  { %724 = vmatprep.subr.bf16.mxu0 %v800_v16  ;;  %v72_v48 = vpack.c.bf16 %v54_v44, %v54_v44  ;;  %498 = vmatprep.mubr.bf16.mxu0 %v70_v47  ;;  %v826_v60 = vld [vmem:[%s1074_s2 + $0x120] sm:$0xff]   ;;  %v828_v62 = vld [vmem:[%s1074_s2 + $0x128] sm:$0xff]   ;;  %v830_v0 = vld [vmem:[%s1074_s2 + $0x130] sm:$0xff]  }
  0x1f   :  { %745 = vmatpush3.bf16.msra.mxu1 %v799_v15  ;;  %v74_v57 = vpack.c.bf16 %v62_v54, %v62_v54  ;;  %v831_v1 = vld [vmem:[%s1074_s2 + $0x178] sm:$0xff]   ;;  %v588_v4 = vld [vmem:[%s587_s24] sm:$0x1] }
  0x20   :  { %746 = vmatprep.subr.bf16.mxu1 %v802_v18  ;;  %538 = vmatprep.mubr.bf16.mxu1 %v72_v48  ;;  %v832_v2 = vld [vmem:[%s1074_s2 + $0x138] sm:$0xff]   ;;  %v592_v5 = vld [vmem:[%s591_s0] sm:$0x1] }
  0x21   :  { %725 = vmatpush3.bf16.msra.mxu0 %v801_v17  ;;  %v593_v6 = vadd.f32 %v592_v5, %v588_v4  ;;  %v596_v7 = vld [vmem:[%s595_s28] sm:$0x1] }
  0x22   :  { %726 = vmatprep.subr.bf16.mxu0 %v804_v20  ;;  %v600_v9 = vld [vmem:[%s599_s7] sm:$0x1] }
  0x23   :  { %747 = vmatpush3.bf16.msra.mxu1 %v803_v19  ;;  %v597_v8 = vadd.f32 %v596_v7, %v593_v6  ;;  %v604_v11 = vld [vmem:[%s603_s12] sm:$0x1] }
  0x24   :  { %748 = vmatprep.subr.bf16.mxu1 %v806_v22  ;;  %v608_v13 = vld [vmem:[%s607_s15] sm:$0x1] }
  0x25   :  { %727 = vmatpush3.bf16.msra.mxu0 %v805_v21  ;;  %v601_v10 = vadd.f32 %v600_v9, %v597_v8  ;;  %v612_v15 = vld [vmem:[%s611_s18] sm:$0x1] }
  0x26   :  { %728 = vmatprep.subr.bf16.mxu0 %v808_v24  ;;  %v616_v17 = vld [vmem:[%s615_s21] sm:$0x1] }
  0x27   :  { %749 = vmatpush3.bf16.msra.mxu1 %v807_v23  ;;  %v605_v12 = vadd.f32 %v604_v11, %v601_v10  ;;  %v660_v24 = vld [vmem:[%s1075_s3] ss:$0 sm:$0xff] }
  0x28   :  { %750 = vmatprep.subr.bf16.mxu1 %v810_v26 }
  0x29   :  { %729 = vmatpush3.bf16.msra.mxu0 %v809_v25  ;;  %v609_v14 = vadd.f32 %v608_v13, %v605_v12 }
  0x2a   :  { %730 = vmatprep.subr.bf16.mxu0 %v812_v29 }
  0x2b   :  { %751 = vmatpush3.bf16.msra.mxu1 %v811_v28  ;;  %v613_v16 = vadd.f32 %v612_v15, %v609_v14 }
  0x2c   :  { %752 = vmatprep.subr.bf16.mxu1 %v814_v31 }
  0x2d   :  { %731 = vmatpush3.bf16.msra.mxu0 %v813_v30  ;;  %v617_v18 = vadd.f32 %v616_v17, %v613_v16 }
  0x2e   :  { %760 = vmatprep.subr.bf16.mxu0 %v816_v37 }
  0x2f   :  { %753 = vmatpush3.bf16.msra.mxu1 %v815_v34  ;;  %v618_v19 = vmul.f32 0.125, %v617_v18 }
  0x30   :  { %499 = vmatmul.mubr.bf16.vlgmr.msra.gmra.mrb[0].mxu0 %v69_v45 }
  0x31   :  { %761 = vmatpush3.bf16.msra.mxu0 %v818_v49  ;;  %578 = vmatprep.mubr.bf16.mxu0 %v74_v57  ;;  %v627_v20 = vmul.f32 %v618_v19, %v618_v19 }
  0x32   :  { %539 = vmatmul.mubr.bf16.vlgmr.msra.gmra.mrb[0].mxu1 %v71_v46  ;;  %762 = vmatprep.subr.bf16.mxu0 %v819_v50  ;;  %v637_v50 = vsub.s32 0, %v979_v32 }
  0x33   :  { %v629_v21 = vsel %vm628_vm0, %v627_v20, 0.0 }
  0x34   :  { %630 = vadd.xlane.f32.xlu0 %v629_v21 }
  0x35   :  { %763 = vmatpush3.bf16.msra.mxu0 %v820_v51 }
  0x36   :  { %764 = vmatprep.subr.bf16.mxu0 %v821_v52 }
  0x39   :  { %765 = vmatpush3.bf16.msra.mxu0 %v822_v55 }
  0x3a   :  { %766 = vmatprep.subr.bf16.mxu0 %v823_v56 }
  0x3d   :  { %767 = vmatpush3.bf16.msra.mxu0 %v824_v58 }
  0x3e   :  { %768 = vmatprep.subr.bf16.mxu0 %v825_v59 }
  0x41   :  { %769 = vmatpush3.bf16.msra.mxu0 %v826_v60 }
  0x42   :  { %770 = vmatprep.subr.bf16.mxu0 %v827_v61 }
  0x45   :  { %771 = vmatpush3.bf16.msra.mxu0 %v828_v62 }
  0x46   :  { %772 = vmatprep.subr.bf16.mxu0 %v829_v63 }
  0x49   :  { %773 = vmatpush3.bf16.msra.mxu0 %v830_v0 }
  0x4a   :  { %774 = vmatprep.subr.bf16.mxu0 %v831_v1 }
  0x4d   :  { %775 = vmatpush3.bf16.msra.mxu0 %v832_v2 }
  0x50   :  { %579 = vmatmul.mubr.bf16.vlgmr.msra.gmra.mrb[4].mxu0 %v73_v3 }
  0xc1   :  { %v631_v44 = vpop.xlane.xlu0 %630 }
  0xc2   :  { %v632_v45 = vadd.f32 1e-12, %v631_v44 }
  0xc4   :  { %833 = vrsqrt.f32 %v632_v45 }
  0xce   :  { %v834_v48 = vpop.eup %833 }
  0xcf   :  { %v634_v49 = vmul.f32 %v834_v48, %v618_v19 }
  0xd1   :  { %v638_v53 = vrot.slane %v634_v49, %v637_v50 }
 0x103   :  { %v732_v22 = vpop.f32.mrb[0].mxu0 }
 0x104   :  { %v733_v25 = vpop.f32.mrb[1].mxu0 }
 0x105   :  { %v754_v23 = vpop.f32.mrb[0].mxu1  ;;  %v734_v27 = vadd.f32 %v733_v25, %v732_v22  ;;  %v735_v28 = vpop.f32.mrb[2].mxu0 }
 0x106   :  { %v755_v26 = vpop.f32.mrb[1].mxu1  ;;  %v736_v31 = vpop.f32.mrb[3].mxu0 }
 0x107   :  { %v756_v29 = vadd.f32 %v755_v26, %v754_v23  ;;  %v757_v30 = vpop.f32.mrb[2].mxu1  ;;  %v501_v34 = vadd.f32 %v734_v27, %v660_v24 }
 0x108   :  { %v758_v33 = vpop.f32.mrb[3].mxu1 }
 0x109   :  { %v541_v35 = vadd.f32 %v756_v29, %v501_v34 }
 0x123   :  { %v776_v36 = vpop.f32.mrb[4].mxu0 }
 0x124   :  { %v777_v37 = vpop.f32.mrb[5].mxu0 }
 0x125   :  { %v778_v38 = vadd.f32 %v777_v37, %v776_v36  ;;  %v779_v39 = vpop.f32.mrb[6].mxu0 }
 0x126   :  { %v780_v40 = vpop.f32.mrb[7].mxu0 }
 0x127   :  { %v581_v41 = vadd.f32 %v778_v38, %v541_v35 }
 0x129   :  { %v619_v42 = vmul.f32 %v581_v41, %v581_v41 }
 0x12b   :  { %v621_v43 = vsel %vm620_vm1, %v619_v42, 0.0 }
 0x12c   :  { %622 = vadd.xlane.f32.xlu0 %v621_v43 }
 0x1b9   :  { %v623_v46 = vpop.xlane.xlu0 %622 }
 0x1ba   :  { %v624_v47 = vadd.f32 1e-12, %v623_v46 }
 0x1bc   :  { %835 = vrsqrt.f32 %v624_v47 }
 0x1c6   :  { %v836_v51 = vpop.eup %835 }
 0x1c7   :  { %v626_v52 = vmul.f32 %v836_v51, %v581_v41 }
 0x1c9   :  { %v639_v54 = vmul.f32 %v638_v53, %v626_v52 }
 0x1cb   :  { %v640_v55 = vsel %vm620_vm1, %v639_v54, 0.0 }
 0x1cc   :  { %641 = vadd.xlane.f32.xlu1 %v640_v55 }
 0x259   :  { %v642_v56 = vpop.xlane.xlu1 %641 }
 0x25a   :  { %v643_v57 = vsub.f32 1.0, %v642_v56 }
 0x25c   :  { %645 = vst.msk [vmem:[%s1077_s5] sm:$0x3] %vm644_vm2, %v643_v57 }
 0x25d   :  { %650 = vsyncpa [#allocation3], 1 }

</bundles_post_ra>
